<compile_context>
chip_gen: v6e
topology: v6e:2x2x1
jax: 0.10.0
libtpu: 0.0.40
codegen_flags: <defaults>
</compile_context>

<pallas_src>
import functools
import math

import numpy as np
import jax
import jax.numpy as jnp
from jax.experimental import pallas as pl
from jax.experimental.pallas import tpu as pltpu


# --------------------------- sizing / knobs -------------------------------- #
# ~1M elements per block: the group kernel keeps ~4-5 block-sized f32
# temporaries live, so 1M elems ~= 16-20 MiB of temps + <=16 MiB of
# double-buffered I/O, which fits the 48 MiB scoped-VMEM request below on
# every generation (v7x physical VMEM is 64 MiB/TC).  At v7x's ~3.2 TB/s an
# 8 MiB in+out step streams in ~2.5 us, so the ~0.35 us/step pipeline overhead
# drops to ~12% (vs ~25% at the old 512K-elem blocks).
_TARGET_BLOCK_ELEMS = 1024 * 1024
_VMEM_LIMIT_BYTES = 48 * 1024 * 1024
# Below this size two pallas_call launches dominate wall-clock; use plain XLA.
_XLA_FALLBACK_ELEMS = 64 * 1024


def _cdiv(a, b):
    return -(-a // b)


def _sublane_align(itemsize):
    # (8,128) f32 tiles pack 2x / 4x along sublanes for 16- / 8-bit dtypes.
    return (8 * 4) // itemsize


def _pick_block_rows(total_rows, width, itemsize, block_rows=None):
    """Rows per block: big enough to amortize ~0.35us/step, sublane aligned."""
    sub = _sublane_align(itemsize)
    if block_rows is None:
        block_rows = max(sub, (_TARGET_BLOCK_ELEMS // width) // sub * sub)
    else:
        block_rows = max(sub, _cdiv(block_rows, sub) * sub)
    if total_rows <= block_rows:
        return total_rows            # single full-extent block (always legal)
    return block_rows


def _compiler_params(semantics):
    return pltpu.CompilerParams(dimension_semantics=semantics,
                                vmem_limit_bytes=_VMEM_LIMIT_BYTES)


# ------------------------------ Pallas kernels ----------------------------- #
def _clip_value_kernel(x_ref, o_ref, *, clip):
    """norm_dim == 1: per-value L2 clip is exactly a magnitude clamp."""
    x = jnp.nan_to_num(x_ref[...].astype(jnp.float32))  # torch.nan_to_num parity
    o_ref[...] = jnp.clip(x, -clip, clip).astype(o_ref.dtype)


def _clip_groups_kernel(mask_ref, x_ref, o_ref, *, clip, group):
    """Clip each group of `group` consecutive lanes to max L2 norm `clip`.

    Per-group reduce / broadcast-back stay within lanes via pltpu.roll (XLU
    slot); leader-lane selection is one multiply with the resident (1, W)
    0/1 mask; 1/norm uses rsqrt on the EUP slot.
    """
    x = jnp.nan_to_num(x_ref[...].astype(jnp.float32))  # torch.nan_to_num parity
    xsq = x * x
    w = x.shape[-1]                                      # multiple of `group`
    # 1) group sum of squares, valid at each group's first ("leader") lane.
    s = xsq
    for k in range(1, group):                            # group is small (e.g. 3)
        s = s + pltpu.roll(xsq, shift=w - k, axis=1)     # lane j <- lane j+k
    s0 = s * mask_ref[...]                               # keep leader lanes only
    # 2) broadcast the leader lane's value to the rest of its group.
    sumsq = s0
    for k in range(1, group):
        sumsq = sumsq + pltpu.roll(s0, shift=k, axis=1)  # lane j <- lane j-k
    # rsqrt(0) = inf -> factor 1 for all-zero groups (clip > 0 assumed).
    factor = jnp.minimum(clip * jax.lax.rsqrt(sumsq), 1.0)
    o_ref[...] = (x * factor).astype(o_ref.dtype)


def _sumsq_kernel(x_ref, part_ref, *, total_rows, ragged):
    """Per-block partial sum of squares (norm_dim == -1, pass 1).

    Each grid step writes its own (1, 1, W) partial so the grid can be marked
    "parallel" (both v7x TensorCores stream); the wrapper reduces the partials.
    The ragged-row mask is emitted only for the last block and only when the
    row count is not a multiple of the block height.
    """
    x = jnp.nan_to_num(x_ref[...].astype(jnp.float32))
    xsq = x * x
    if ragged:
        i = pl.program_id(0)
        last = pl.num_programs(0) - 1

        @pl.when(i == last)
        def _():
            row = jax.lax.broadcasted_iota(jnp.int32, x.shape, 0) + i * x.shape[0]
            masked = jnp.where(row < total_rows, xsq, 0.0)
            part_ref[...] = jnp.sum(masked, axis=0, keepdims=True)[None]

        @pl.when(i != last)
        def _():
            part_ref[...] = jnp.sum(xsq, axis=0, keepdims=True)[None]
    else:
        part_ref[...] = jnp.sum(xsq, axis=0, keepdims=True)[None]


def _scale_kernel(factor_ref, x_ref, o_ref):
    """Elementwise scale by a runtime scalar (norm_dim == -1, pass 2)."""
    x = jnp.nan_to_num(x_ref[...].astype(jnp.float32))
    o_ref[...] = (x * factor_ref[0]).astype(o_ref.dtype)


# ------------------------------ XLA helpers -------------------------------- #
def _clip_groups_xla(flat, clip, group):
    """Plain-XLA group clip (small tensors and <width tails)."""
    x = jnp.nan_to_num(flat.astype(jnp.float32)).reshape(-1, group)
    sumsq = jnp.sum(x * x, axis=-1, keepdims=True)
    factor = jnp.minimum(clip * jax.lax.rsqrt(sumsq), 1.0)
    return (x * factor).reshape(-1).astype(flat.dtype)


def _clip_whole_xla(flat, clip):
    """Plain-XLA whole-tensor clip (small-tensor fallback)."""
    x = jnp.nan_to_num(flat.astype(jnp.float32))
    factor = jnp.minimum(clip * jax.lax.rsqrt(jnp.sum(x * x)), 1.0)
    return (x * factor).astype(flat.dtype)


# ------------------------------ Pallas paths ------------------------------- #
def _clip_grouped_pallas(flat, clip, group, block_rows):
    n = flat.shape[0]
    itemsize = flat.dtype.itemsize
    # Lane width: multiple of 128 (unmasked, lane-dense vst) and of `group`
    # (a group never straddles a row); group == 1 just wants wide rows.
    width = 512 if group == 1 else group * 128 // math.gcd(group, 128)
    rows, tail = divmod(n, width)
    if rows == 0:                      # smaller than one row: not worth a kernel
        return _clip_groups_xla(flat, clip, group)

    # Aligned bulk goes through the kernel via a zero-copy reshape; the
    # (<width)-element tail is a tiny XLA op.  tail == 0 (fast path) costs no
    # extra HBM traffic; tail != 0 still pays one bulk slice + one concatenate
    # because XLA slices are copies, not views.
    # TODO(synk): a fully copy-free ragged path needs manual 1-D DMA
    # (memory_space=pl.ANY) so the kernel reads/writes the unpadded flat buffer.
    bulk = flat if tail == 0 else flat[:rows * width]
    x2d = bulk.reshape(rows, width)
    tr = _pick_block_rows(rows, width, itemsize, block_rows)
    grid = (_cdiv(rows, tr),)

    if group == 1:
        out2d = pl.pallas_call(
            functools.partial(_clip_value_kernel, clip=clip),
            out_shape=jax.ShapeDtypeStruct((rows, width), flat.dtype),
            grid_spec=pl.GridSpec(
                grid=grid,
                in_specs=[pl.BlockSpec((tr, width), lambda i: (i, 0))],
                out_specs=pl.BlockSpec((tr, width), lambda i: (i, 0))),
            compiler_params=_compiler_params(("parallel",)),
        )(x2d)
    else:
        # Trace-time constant leader mask, passed as a tiny resident input
        # (constant index_map -> DMA'd once) instead of recomputing
        # iota/mod/compare/select on the VALU every grid step.
        leader = (np.arange(width) % group == 0).astype(np.float32)
        out2d = pl.pallas_call(
            functools.partial(_clip_groups_kernel, clip=clip, group=group),
            out_shape=jax.ShapeDtypeStruct((rows, width), flat.dtype),
            grid_spec=pl.GridSpec(
                grid=grid,
                in_specs=[pl.BlockSpec((1, width), lambda i: (0, 0)),
                          pl.BlockSpec((tr, width), lambda i: (i, 0))],
                out_specs=pl.BlockSpec((tr, width), lambda i: (i, 0))),
            compiler_params=_compiler_params(("parallel",)),
        )(jnp.asarray(leader.reshape(1, width)), x2d)

    if tail == 0:
        return out2d.reshape(-1)
    tail_out = _clip_groups_xla(flat[rows * width:], clip, group)
    return jnp.concatenate([out2d.reshape(-1), tail_out])


def _clip_whole_pallas(flat, clip, block_rows):
    n = flat.shape[0]
    itemsize = flat.dtype.itemsize
    width = 512
    for cand in (512, 256, 128):       # prefer a width that divides n (zero-copy)
        if n % cand == 0:
            width = cand
            break
    rows, tail = divmod(n, width)
    if rows == 0:
        return _clip_whole_xla(flat, clip)

    bulk = flat if tail == 0 else flat[:rows * width]
    x2d = bulk.reshape(rows, width)
    tr = _pick_block_rows(rows, width, itemsize, block_rows)
    nblk = _cdiv(rows, tr)
    grid = (nblk,)
    ragged = (rows % tr) != 0
    tail_f32 = None
    if tail:
        tail_f32 = jnp.nan_to_num(flat[rows * width:].astype(jnp.float32))

    # Pass 1: per-block partial sums of squares ("parallel" grid).  The tiny
    # (nblk, 1, width) partial array is reduced to the scalar factor in plain
    # XLA; folding it into pass 2 would force an "arbitrary" (serialized) grid,
    # which costs more than the one tiny XLA reduce it saves.
    partials = pl.pallas_call(
        functools.partial(_sumsq_kernel, total_rows=rows, ragged=ragged),
        out_shape=jax.ShapeDtypeStruct((nblk, 1, width), jnp.float32),
        grid_spec=pl.GridSpec(
            grid=grid,
            in_specs=[pl.BlockSpec((tr, width), lambda i: (i, 0))],
            out_specs=pl.BlockSpec((1, 1, width), lambda i: (i, 0, 0))),
        compiler_params=_compiler_params(("parallel",)),
    )(x2d)

    sumsq = jnp.sum(partials)
    if tail:
        sumsq = sumsq + jnp.sum(tail_f32 * tail_f32)
    factor = jnp.minimum(clip * jax.lax.rsqrt(sumsq), 1.0).astype(jnp.float32)

    # Pass 2: scale by the runtime scalar (SMEM operand), "parallel" grid.
    out2d = pl.pallas_call(
        _scale_kernel,
        out_shape=jax.ShapeDtypeStruct((rows, width), flat.dtype),
        grid_spec=pl.GridSpec(
            grid=grid,
            in_specs=[pl.BlockSpec(memory_space=pltpu.SMEM),
                      pl.BlockSpec((tr, width), lambda i: (i, 0))],
            out_specs=pl.BlockSpec((tr, width), lambda i: (i, 0))),
        compiler_params=_compiler_params(("parallel",)),
    )(factor.reshape((1,)), x2d)

    if tail == 0:
        return out2d.reshape(-1)
    tail_out = (tail_f32 * factor).astype(flat.dtype)
    return jnp.concatenate([out2d.reshape(-1), tail_out])


# ------------------------------ public wrapper ----------------------------- #
def clip_tensor_pallas(tensor, clip, norm_dim, *, block_rows=None,
                       min_kernel_elems=_XLA_FALLBACK_ELEMS):
    """JAX/Pallas equivalent of ClipGradient.clip_tensor.

    norm_dim == 1   : clip each value (magnitude clamp)
    norm_dim == k>1 : clip each group of k consecutive values (3 = per atom)
    norm_dim == -1  : clip the norm of the whole tensor
    """
    clip = float(clip)
    orig_shape = tensor.shape
    n = tensor.size
    if n == 0:
        return tensor
    flat = tensor.reshape(-1)          # original dtype stays in HBM (no upcast)

    if norm_dim == -1:
        if n < min_kernel_elems:
            out = _clip_whole_xla(flat, clip)
        else:
            out = _clip_whole_pallas(flat, clip, block_rows)
    else:
        group = int(norm_dim)
        assert group >= 1 and n % group == 0, "size must be divisible by norm_dim"
        if n < min_kernel_elems:
            out = _clip_groups_xla(flat, clip, group)
        else:
            out = _clip_grouped_pallas(flat, clip, group, block_rows)
    return out.reshape(orig_shape)


# -------------------- ClipGradient module (custom VJP) --------------------- #
def make_clip_gradient(clip, norm_dim=1):
    """ClipGradient: forward is identity, backward clips the gradient."""

    @jax.custom_vjp
    def _identity(x):
        return x

    def _fwd(x):
        return x, None

    def _bwd(_, g):
        return (clip_tensor_pallas(g, clip, norm_dim),)

    _identity.defvjp(_fwd, _bwd)

    def clip_gradient(*xs):            # mirrors forward(*xs) / unpack_tensor_tuple
        ys = tuple(_identity(x) for x in xs)
        return ys[0] if len(ys) == 1 else ys

    return clip_gradient


# ------------------------------ reference ---------------------------------- #
def clip_tensor_ref(tensor, clip, norm_dim):
    orig_shape = tensor.shape
    flat = jnp.nan_to_num(tensor.astype(jnp.float32)).reshape(-1)
    x2d = flat.reshape(1, -1) if norm_dim == -1 else flat.reshape(-1, norm_dim)
    norm = jnp.linalg.norm(x2d, axis=-1, keepdims=True)
    factor = jnp.minimum(jnp.float32(clip) / norm, 1.0)
    return (x2d * factor).reshape(orig_shape).astype(tensor.dtype)


# --------------------------------- main ------------------------------------ #
if __name__ == "__main__":
    clip_val = 0.5
    kx, kw = jax.random.split(jax.random.PRNGKey(0))

    # Typical pepflow gradient shape: batch=2, atoms=16, coords=3.
    x = jax.random.normal(kx, (2, 16, 3), dtype=jnp.float32) * 2.0
    w = jax.random.normal(kw, (2, 16, 3), dtype=jnp.float32) * 3.0

    # 1) Tiny gradients take the XLA fallback (default threshold); all modes.
    g = x.at[0, 0, 1].set(jnp.nan)
    for nd in (1, 3, -1):
        out = jax.block_until_ready(clip_tensor_pallas(g, clip_val, nd))
        ref = clip_tensor_ref(g, clip_val, nd)
        assert jnp.allclose(out, ref, atol=1e-5, rtol=1e-5), f"fallback nd={nd}"

    # 2) Pallas path, zero-copy (flat size divides the lane width), multi-block
    #    grid with a ragged last block (block_rows=8 override).
    big = jax.random.normal(jax.random.PRNGKey(1), (16, 96, 3), dtype=jnp.float32)
    big = big.at[0, 0, 0].set(jnp.nan)
    for nd in (1, 3, -1):
        out = jax.block_until_ready(clip_tensor_pallas(
            big, clip_val, nd, block_rows=8, min_kernel_elems=0))
        ref = clip_tensor_ref(big, clip_val, nd)
        assert jnp.allclose(out, ref, atol=1e-5, rtol=1e-5), f"pallas nd={nd}"

    # 3) Pallas bulk + XLA tail (flat size NOT a multiple of the lane width).
    odd = jax.random.normal(jax.random.PRNGKey(2), (5, 100, 3), dtype=jnp.float32)
    for nd in (1, 3, -1):
        out = jax.block_until_ready(clip_tensor_pallas(
            odd, clip_val, nd, min_kernel_elems=0))
        ref = clip_tensor_ref(odd, clip_val, nd)
        assert jnp.allclose(out, ref, atol=1e-5, rtol=1e-5), f"tail nd={nd}"

    # 4) Default-path Pallas (above the fallback threshold), default blocks.
    large = jax.random.normal(jax.random.PRNGKey(3), (128, 256, 3),
                              dtype=jnp.float32) * 2.0
    for nd in (3, -1):
        out = jax.block_until_ready(clip_tensor_pallas(large, clip_val, nd))
        ref = clip_tensor_ref(large, clip_val, nd)
        assert jnp.allclose(out, ref, atol=1e-5, rtol=1e-5), f"large nd={nd}"

    # 5) bf16 gradients stay bf16 in HBM (16-row sublane-aligned blocks).
    gb = big.astype(jnp.bfloat16)
    out = jax.block_until_ready(clip_tensor_pallas(gb, clip_val, 3,
                                                   min_kernel_elems=0))
    ref = clip_tensor_ref(gb, clip_val, 3)
    assert jnp.allclose(out.astype(jnp.float32), ref.astype(jnp.float32),
                        atol=1e-2, rtol=1e-2), "bf16 mismatch"

    # 6) Module semantics: forward is identity, backward clips the gradient.
    f = make_clip_gradient(clip_val, norm_dim=3)
    y = jax.block_until_ready(f(x))
    assert jnp.allclose(y, x), "forward must be identity"
    grad = jax.block_until_ready(jax.grad(lambda t: jnp.sum(f(t) * w))(x))
    grad_ref = clip_tensor_ref(w, clip_val, 3)   # cotangent of sum(f(t)*w) is w
    assert jnp.allclose(grad, grad_ref, atol=1e-5, rtol=1e-5), "grad mismatch"

    print("KERNEL_OK")
</pallas_src>

<mosaic_0001>
module attributes {stable_mosaic.version = 11 : i64} {
  func.func @_clip_value_kernel(%arg0: i32, %arg1: memref<8x512xf32, #tpu.memory_space<vmem>>, %arg2: memref<8x512xf32, #tpu.memory_space<vmem>>) attributes {dimension_semantics = [#tpu.dimension_semantics<parallel>], iteration_bounds = array<i64: 2>, scalar_prefetch = 0 : i64, scratch_operands = 0 : i64, tpu.core_type = #tpu.core_type<tc>, window_params = [{transform_indices = @transform_0, window_bounds = array<i64: 8, 512>}, {transform_indices = @transform_1, window_bounds = array<i64: 8, 512>}]} {
    %c0 = arith.constant 0 : index
    %c0_0 = arith.constant 0 : index
    %0 = vector.load %arg1[%c0, %c0_0] : memref<8x512xf32, #tpu.memory_space<vmem>>, vector<8x512xf32>
    %1 = arith.cmpf one, %0, %0 : vector<8x512xf32>
    %cst = arith.constant 0.000000e+00 : f32
    %2 = vector.broadcast %cst : f32 to vector<8x512xf32>
    %3 = arith.select %1, %2, %0 : vector<8x512xi1>, vector<8x512xf32>
    %cst_1 = arith.constant 0x7F800000 : f32
    %4 = vector.broadcast %cst_1 : f32 to vector<8x512xf32>
    %5 = arith.cmpf oeq, %3, %4 : vector<8x512xf32>
    %cst_2 = arith.constant 3.40282347E+38 : f32
    %6 = vector.broadcast %cst_2 : f32 to vector<8x512xf32>
    %7 = arith.select %5, %6, %3 : vector<8x512xi1>, vector<8x512xf32>
    %cst_3 = arith.constant 0xFF800000 : f32
    %8 = vector.broadcast %cst_3 : f32 to vector<8x512xf32>
    %9 = arith.cmpf oeq, %7, %8 : vector<8x512xf32>
    %cst_4 = arith.constant -3.40282347E+38 : f32
    %10 = vector.broadcast %cst_4 : f32 to vector<8x512xf32>
    %11 = arith.select %9, %10, %7 : vector<8x512xi1>, vector<8x512xf32>
    %cst_5 = arith.constant -5.000000e-01 : f32
    %cst_6 = arith.constant 5.000000e-01 : f32
    %12 = vector.broadcast %cst_5 : f32 to vector<8x512xf32>
    %13 = arith.maximumf %12, %11 : vector<8x512xf32>
    %14 = vector.broadcast %cst_6 : f32 to vector<8x512xf32>
    %15 = arith.minimumf %14, %13 : vector<8x512xf32>
    %c0_7 = arith.constant 0 : index
    %c0_8 = arith.constant 0 : index
    %16 = vector.load %arg2[%c0_7, %c0_8] : memref<8x512xf32, #tpu.memory_space<vmem>>, vector<8x512xf32>
    tpu.vector_store %arg2[%c0_7, %c0_8], %15 {strides = array<i32>} : memref<8x512xf32, #tpu.memory_space<vmem>>, vector<8x512xf32>,
    return
  }
  func.func @transform_0(%arg0: i32) -> (i32, i32) {
    %c0_i32 = arith.constant 0 : i32
    %c0_i32_0 = arith.constant 0 : i32
    return %arg0, %c0_i32 : i32, i32
  }
  func.func @transform_1(%arg0: i32) -> (i32, i32) {
    %c0_i32 = arith.constant 0 : i32
    %c0_i32_0 = arith.constant 0 : i32
    return %arg0, %c0_i32 : i32, i32
  }
}

</mosaic_0001>

<bundles_post_ra>
// kernel: tpu_custom_call.1
= control target key start
LH: loop header
LB: loop body
LE: loop exit
PB: predicated region body
PF: predicated region fallthrough
CT: control target
= control target key end

     0   :  { %6 = vsyncpa [#allocation3], 0  ;;  %s577_s0 = inlined_call_operand.hbm [shape: f32[9,512], index: 0, kind: input, shape index: {}]   ;;  %s578_s1 = inlined_call_operand.hbm [shape: f32[9,512], index: 1, kind: output, shape index: {}]  }
   0x1   :  { %8 = vsyncpa [#allocation3 + $0x1], 0 }
   0x2   :  { %9 = vsyncpa [#allocation4], 0 }
   0x3   :  { %11 = vsyncpa [#allocation4 + $0x1], 0  ;;  %s430_s6 = smov 0   ;;  %s432_s7 = smov 0  }
   0x4   :  { %s434_s8 = smov 0   ;;  %s436_s9 = smov 0  }
   0x5 LB: > { %s451_s10 = sadd.s32 4294967295, %s416_s9   ;;  %s258_s11 = sadd.s32 4294967294, %s416_s9   ;;  %s416_s9 = sphi %s436_s9, %s595_s9   ;;  %s412_s8 = sphi %s434_s8, %s594_s8   ;;  %s408_s7 = sphi %s432_s7, %s593_s7   ;;  %s404_s6 = sphi %s430_s6, %s592_s6  }
   0x6   : > { %s455_s12 = sadd.s32 1, %s416_s9   ;;  %s24_s13 = sadd.s32 1, %s412_s8 }
   0x7   : > { %s21_s14 = ssub.s32 %s416_s9, %s455_s12  ;;  %p31_p0 = scmp.ne.s32.totalorder %s412_s8, %s408_s7 }
   0x8   : > { %p22_p1 = scmp.eq.s32.totalorder %s21_s14, 0  ;;  %p32_p2 = scmp.eq.s32.totalorder %s416_s9, 0 }
   0x9   : > { %p37_p3 = scmp.ne.s32.totalorder %s408_s7, %s404_s6  ;;  %p38_p4 = scmp.eq.s32.totalorder %s451_s10, 0 }
   0xa   : > { %s467_s15 = scalar_select %p22_p1, %s412_s8, %s24_s13  }
   0xb   : > { %p469_p5 = por %p32_p2, %p31_p0  ;;  %p473_p6 = por %p38_p4, %p37_p3 }
   0xc   : > { %p61_p7 = scmp.eq.s32.totalorder %s451_s10, 1  ;;  %p67_p8 = scmp.eq.s32.totalorder %s258_s11, 1 }
   0xd   : > { %s582_s17 = scalar_select %p473_p6, 1, 0 }
   0xe   : > { %p290_p10 = scmp.lt.s32.totalorder %s416_s9, 2  ;;  %p480_p11 = por %p61_p7, %p31_p0 }
   0xf   : > { %p484_p12 = por %p67_p8, %p37_p3  ;;  %s87_s20 = sand.u32 1, %s412_s8  }
  0x10   : > { %s583_s18 = scalar_select %p480_p11, 1, 0 }
  0x11   : > { %s584_s19 = scalar_select %p484_p12, 1, 0 }
  0x12   : > { %s276_s21 = sshll.u32 %s416_s9, 9  ;;  %s261_s22 = sshll.u32 %s87_s20, 5 }
  0x13   : > { %s493_s25 = scalar_lea.hbm %s577_s0, %s276_s21  ;;  %s91_s26 = scalar_lea.vmem [#allocation2], %s261_s22 }
  0x14   : > { %s99_s27 = sshll.u32 %s91_s26, 4  ;;  %p497_p13 = pnand %p290_p10, %p469_p5  ;;  %s501_s27 = int_to_ptr.vmem [resolvable:$true] %s99_s27 }
  0x15   : > { %s88_s29 = scalar_lea.sflag [#allocation3], %s87_s20  ;;  %s324_s30 = scalar_lea.hbm %s493_s25, 512 }
  0x16   : > { %p325_p2 = scmp.ne.s32.totalorder %s493_s25, %s324_s30  ;;  %p326_p3 = pneg %p497_p13 }
  0x17   : > { %s329_s4 = scalar_lea.hbm %s577_s0, 1024  ;;  %p330_p5 = scmp.lt.s32.totalorder %s493_s25, %s577_s0 }
  0x18   : > { %p327_p4 = pnand %p326_p3, %p325_p2  ;;  %p331_p8 = scmp.lt.s32.totalorder %s329_s4, %s324_s30 }
  0x1a   : > { %p328_p7 = pneg %p327_p4  ;;  %p332_p10 = por %p331_p8, %p330_p5 }
  0x1c   : > { %p333_p9 = pnand %p332_p10, %p328_p7 }
  0x1e   : > { %336 = shalt.err (!%p333_p9)
}
  0x1f   : > { %s337_s13 = scalar_lea.vmem %s501_s27, 512  ;;  %s418_s14 = smov [#allocation2]  }
  0x20   : > { %p338_p0 = scmp.ne.s32.totalorder %s501_s27, %s337_s13  ;;  %s342_s16 = sshll.u32 %s418_s14, 4  ;;  %s343_s16 = int_to_ptr.vmem [resolvable:$false] %s342_s16 }
  0x21   : > { %s344_s20 = scalar_lea.vmem %s343_s16, 1024  ;;  %p345_p4 = scmp.lt.s32.totalorder %s501_s27, %s343_s16 }
  0x22   : > { %p340_p1 = pnand %p338_p0, %p326_p3  ;;  %p346_p12 = scmp.lt.s32.totalorder %s344_s20, %s337_s13 }
  0x24   : > { %p341_p2 = pneg %p340_p1  ;;  %p347_p11 = por %p346_p12, %p345_p4 }
  0x26   : > { %p348_p6 = pnand %p347_p11, %p341_p2 }
  0x28   : > { %351 = shalt.err (!%p348_p6)
}
  0x29   : > { %285 = dma.hbm_to_vmem [thread:$0]  (!%p497_p13), %s493_s25, 512, %s501_s27, %s88_s29  }
  0x2a   : > { %p586_p9 = scmp.lt.s32.totalorder %s416_s9, 3  ;;  %p587_p7 = scmp.ge.s32.totalorder %s416_s9, 1 }
  0x2c   : > { %p105_p0 = pnand %p587_p7, %p586_p9 }
  0x2d   : > { %s528_s21 = sand.u32 (!%p105_p0), 1, %s408_s7   ;;  %p588_p6 = scmp.ne.s32.totalorder (!%p105_p0), %s582_s17, 0 }
  0x2e   : > { %108 = sbr.rel (%p105_p0) target bundleno = 81 (0x51), region = 24  ;;  %s265_s22 = sshll.u32 (!%p105_p0), %s528_s21, 5 }
  0x2f   : > { %s111_s23 = scalar_lea.sflag (!%p105_p0), [#allocation3], %s528_s21  ;;  %s114_s24 = scalar_lea.vmem (!%p105_p0), [#allocation2], %s265_s22 }
  0x33   : > { %395 = dma.done.wait (%p588_p6), %s111_s23, 512  }
  0x34   : > { %397 = vsyncadd (%p588_p6), %s111_s23, 4294966784  ;;  %v133_v0 = vld [vmem:[%s114_s24] sm:$0xff]  ;;  %v134_v1 = vld [vmem:[%s114_s24 + $0x8] sm:$0xff]  ;;  %s132_s17 = scalar_lea.vmem [#allocation5], %s265_s22  ;;  %s277_s26 = sshll.u32 %s451_s10, 9 }
  0x35   : > { %v135_v2 = vld [vmem:[%s114_s24 + $0x10] sm:$0xff]  ;;  %vm137_vm0 = vcmp.ne.f32.partialorder %v133_v0, %v133_v0  ;;  %vm138_vm1 = vcmp.ne.f32.partialorder %v134_v1, %v134_v1  ;;  %v136_v3 = vld [vmem:[%s114_s24 + $0x18] sm:$0xff]  ;;  %s188_s25 = sshll.u32 %s132_s17, 4  ;;  %s186_s29 = scalar_lea.hbm %s578_s1, %s277_s26  ;;  %s537_s25 = int_to_ptr.vmem [resolvable:$true] %s188_s25 }
  0x36   : > { %vm139_vm2 = vcmp.ne.f32.partialorder %v135_v2, %v135_v2  ;;  %v141_v4 = vsel %vm137_vm0, 0.0, %v133_v0  ;;  %v142_v5 = vsel %vm138_vm1, 0.0, %v134_v1  ;;  %vm140_vm3 = vcmp.ne.f32.partialorder %v136_v3, %v136_v3  ;;  %s174_s30 = scalar_lea.sflag [#allocation4], %s528_s21  ;;  %s352_s2 = scalar_lea.vmem %s537_s25, 512 }
  0x37   : > { %v143_v6 = vsel %vm139_vm2, 0.0, %v135_v2  ;;  %vm145_vm4 = vcmp.eq.f32.partialorder %v141_v4, inf  ;;  %vm146_vm5 = vcmp.eq.f32.partialorder %v142_v5, inf  ;;  %v144_v7 = vsel %vm140_vm3, 0.0, %v136_v3  ;;  %p353_p11 = scmp.ne.s32.totalorder %s537_s25, %s352_s2  ;;  %p589_p12 = scmp.ne.s32.totalorder %s583_s18, 0 }
  0x38   : > { %vm147_vm6 = vcmp.eq.f32.partialorder %v143_v6, inf  ;;  %v149_v8 = vsel %vm145_vm4, 3.4028235e+38, %v141_v4  ;;  %v150_v9 = vsel %vm146_vm5, 3.4028235e+38, %v142_v5  ;;  %vm148_vm10 = vcmp.eq.f32.partialorder %v144_v7, inf }
  0x39   : > { %v151_v10 = vsel %vm147_vm6, 3.4028235e+38, %v143_v6  ;;  %vm153_vm7 = vcmp.eq.f32.partialorder %v149_v8, -inf  ;;  %vm154_vm8 = vcmp.eq.f32.partialorder %v150_v9, -inf  ;;  %v152_v17 = vsel %vm148_vm10, 3.4028235e+38, %v144_v7  ;;  %p354_p13 = pnand %p353_p11, %p589_p12 }
  0x3a   : > { %vm155_vm9 = vcmp.eq.f32.partialorder %v151_v10, -inf  ;;  %v157_v11 = vsel %vm153_vm7, -3.4028235e+38, %v149_v8  ;;  %v158_v12 = vsel %vm154_vm8, -3.4028235e+38, %v150_v9  ;;  %vm156_vm11 = vcmp.eq.f32.partialorder %v152_v17, -inf }
  0x3b   : > { %v159_v13 = vsel %vm155_vm9, -3.4028235e+38, %v151_v10  ;;  %v267_v14 = vclamps-f32 %v157_v11, 0.5  ;;  %v268_v15 = vclamps-f32 %v158_v12, 0.5  ;;  %v160_v18 = vsel %vm156_vm11, -3.4028235e+38, %v152_v17  ;;  %p355_p1 = pneg %p354_p13 }
  0x3c   : > { %v269_v16 = vclamps-f32 %v159_v13, 0.5  ;;  %v270_v19 = vclamps-f32 %v160_v18, 0.5  ;;  %s419_s10 = smov [#allocation5]  }
  0x3d   : > { %169 = vst [vmem:[%s132_s17] sm:$0xff] %v267_v14  ;;  %170 = vst [vmem:[%s132_s17 + $0x8] sm:$0xff] %v268_v15  ;;  %s356_s3 = sshll.u32 %s419_s10, 4  ;;  %s357_s3 = int_to_ptr.vmem [resolvable:$false] %s356_s3 }
  0x3e   : > { %171 = vst [vmem:[%s132_s17 + $0x10] sm:$0xff] %v269_v16  ;;  %172 = vst [vmem:[%s132_s17 + $0x18] sm:$0xff] %v270_v19  ;;  %s358_s4 = scalar_lea.vmem %s357_s3, 1024  ;;  %p359_p3 = scmp.lt.s32.totalorder %s537_s25, %s357_s3 }
  0x3f   : > { %p360_p5 = scmp.lt.s32.totalorder %s358_s4, %s352_s2 }
  0x41   : > { %p361_p8 = por %p360_p5, %p359_p3 }
  0x43   : > { %p362_p10 = pnand %p361_p8, %p355_p1 }
  0x45   : > { %365 = shalt.err (!%p362_p10)
}
  0x46   : > { %s366_s5 = scalar_lea.hbm %s186_s29, 512  ;;  %s370_s14 = scalar_lea.hbm %s578_s1, 1024 }
  0x47   : > { %p367_p2 = scmp.ne.s32.totalorder %s186_s29, %s366_s5  ;;  %p371_p7 = scmp.lt.s32.totalorder %s186_s29, %s578_s1 }
  0x48   : > { %p372_p0 = scmp.lt.s32.totalorder %s370_s14, %s366_s5 }
  0x49   : > { %p368_p4 = pnand %p367_p2, %p589_p12 }
  0x4a   : > { %p373_p6 = por %p372_p0, %p371_p7 }
  0x4b   : > { %p369_p9 = pneg %p368_p4 }
  0x4d   : > { %p374_p11 = pnand %p373_p6, %p369_p9 }
  0x4f   : > { %377 = shalt.err (!%p374_p11)
}
  0x50   : > { %280 = dma.vmem_to_hbm [thread:$0]  (%p589_p12), %s537_s25, 512, %s186_s29, %s174_s30  }
  0x51 PF: > { %s200_s21 = sand.u32 1, %s404_s6   ;;  %p590_p13 = scmp.ne.s32.totalorder %s584_s19, 0 }
  0x52   : > { %p591_p1 = scmp.ge.s32.totalorder %s416_s9, 2  ;;  %s201_s22 = scalar_lea.sflag [#allocation4], %s200_s21 }
  0x54   : > { %p287_p3 = pnand %p591_p1, %p590_p13 }
  0x56   : > { %p288_p5 = pneg %p287_p3 }
  0x58   : > { %399 = dma.done.wait (%p288_p5), %s201_s22, 512  }
  0x59   : > { %401 = vsyncadd (%p288_p5), %s201_s22, 4294966784  ;;  %p14_p8 = scmp.ge.s32.totalorder %s455_s12, 4   ;;  %s592_s6 = smov %s408_s7 }
  0x5a   : > { %s593_s7 = smov %s412_s8  ;;  %s594_s8 = smov %s467_s15 }
  0x5b   : > { %s595_s9 = smov %s455_s12  ;;  %16 = sbr.rel (!%p14_p8) target bundleno = 5 (0x5), region = 69 }
  0x60   :  { %206 = vsyncpa [#allocation3], 1 }
  0x61   :  { %208 = vsyncpa [#allocation3 + $0x1], 1 }
  0x62   :  { %209 = vsyncpa [#allocation4], 1 }
  0x63   :  { %211 = vsyncpa [#allocation4 + $0x1], 1 }

</bundles_post_ra>
